<compile_context>
chip_gen: v6e
topology: v6e:2x2x1
jax: 0.10.0
libtpu: 0.0.40
codegen_flags: <defaults>
</compile_context>

<pallas_src>
import math

import jax
import jax.numpy as jnp
from jax.experimental import pallas as pl
from jax.experimental.pallas import tpu as pltpu


def _dma_copy_kernel(x_hbm, o_hbm, sem):
    # One whole-array HBM->HBM DMA; no tiling, no padding, no masked stores.
    cp = pltpu.make_async_copy(x_hbm, o_hbm, sem)
    cp.start()
    cp.wait()


def _resolve_shape(x, shape):
    """torch-style trailing-dim resolution (supports a single -1)."""
    b = x.shape[0]
    n_in = math.prod(x.shape[1:]) if x.ndim > 1 else 1
    shape = tuple(int(s) for s in shape)
    neg = [i for i, s in enumerate(shape) if s == -1]
    assert len(neg) <= 1, "at most one -1 allowed in reshape target"
    if neg:
        known = math.prod(s for i, s in enumerate(shape) if i != neg[0])
        assert known > 0 and n_in % known == 0, (
            f"cannot infer -1 reshaping {x.shape} to ({b}, *{shape})")
        shape = shape[: neg[0]] + (n_in // known,) + shape[neg[0] + 1:]
    n_out = math.prod(shape) if shape else 1
    assert n_in == n_out, f"cannot reshape {x.shape} to ({b}, *{shape})"
    return (b, *shape)


def reshape_pallas(x, *shape, materialize=True):
    """Equivalent to torch: x.reshape(x.shape[0], *shape).

    materialize=False: contiguous reshape is metadata-only -> free jnp.reshape
    (recommended production path).
    materialize=True: force a fresh buffer via a single HBM->HBM DMA kernel.
    """
    out_shape = _resolve_shape(x, shape)

    # Fast path (perf-review item 1): no kernel, no data movement.
    if not materialize:
        return jnp.reshape(x, out_shape)

    # Metadata-only view with the target shape; the kernel then performs one
    # full-array HBM->HBM DMA into a fresh output buffer.
    x_view = jnp.reshape(x, out_shape)
    itemsize = jnp.dtype(x.dtype).itemsize
    total = math.prod(out_shape)

    return pl.pallas_call(
        _dma_copy_kernel,
        out_shape=jax.ShapeDtypeStruct(out_shape, x.dtype),
        in_specs=[pl.BlockSpec(memory_space=pl.ANY)],
        out_specs=pl.BlockSpec(memory_space=pl.ANY),
        scratch_shapes=[pltpu.SemaphoreType.DMA(())],
        cost_estimate=pl.CostEstimate(
            flops=0,
            transcendentals=0,
            bytes_accessed=2 * total * itemsize,
        ),
    )(x_view)


if __name__ == "__main__":
    key = jax.random.PRNGKey(0)

    # Input consistent with an NCHW tensor: batch=2, channels=4, spatial=16x16.
    x = jax.random.normal(key, (2, 4, 16, 16), dtype=jnp.float32)

    # Module instantiated as Reshape(8, 128): (2, 4, 16, 16) -> (2, 8, 128).
    y = reshape_pallas(x, 8, 128)
    jax.block_until_ready(y)
    y_ref = x.reshape(x.shape[0], 8, 128)
    assert y.shape == (2, 8, 128), y.shape
    assert y.dtype == x.dtype
    assert bool(jnp.all(y == y_ref))

    # Ragged total (210 elements): DMA path needs no padding / masking / slice.
    x2 = jax.random.normal(jax.random.PRNGKey(1), (2, 3, 5, 7), dtype=jnp.float32)
    y2 = reshape_pallas(x2, 105)
    jax.block_until_ready(y2)
    assert y2.shape == (2, 105)
    assert bool(jnp.all(y2 == x2.reshape(2, 105)))

    # bf16 case: no dtype-dependent sublane rounding needed with a DMA copy.
    x3 = jax.random.normal(jax.random.PRNGKey(2), (4, 8, 32, 32), dtype=jnp.bfloat16)
    y3 = reshape_pallas(x3, 64, 128)
    jax.block_until_ready(y3)
    assert y3.shape == (4, 64, 128) and y3.dtype == jnp.bfloat16
    assert bool(jnp.all(y3 == x3.reshape(4, 64, 128)))

    # -1 inference + metadata-only fast path (no kernel launched).
    y4 = reshape_pallas(x, -1, 64, materialize=False)
    jax.block_until_ready(y4)
    assert y4.shape == (2, 16, 64)
    assert bool(jnp.all(y4 == x.reshape(2, 16, 64)))

    print("KERNEL_OK")
</pallas_src>

<mosaic_0001>
module attributes {stable_mosaic.version = 11 : i64} {
  func.func @_dma_copy_kernel(%arg0: memref<2x8x128xf32, #tpu.memory_space<any>>, %arg1: memref<2x8x128xf32, #tpu.memory_space<any>>, %arg2: memref<!tpu.dma_semaphore, #tpu.memory_space<semaphore_mem>>) attributes {dimension_semantics = [], scalar_prefetch = 0 : i64, scratch_operands = 1 : i64, tpu.core_type = #tpu.core_type<tc>} {
    tpu.enqueue_dma source(%arg0 : memref<2x8x128xf32, #tpu.memory_space<any>>) target(%arg1 : memref<2x8x128xf32, #tpu.memory_space<any>>) target_semaphore(%arg2 : memref<!tpu.dma_semaphore, #tpu.memory_space<semaphore_mem>>)
    tpu.wait_dma2 semaphore(%arg2 : memref<!tpu.dma_semaphore, #tpu.memory_space<semaphore_mem>>) src(%arg0 : memref<2x8x128xf32, #tpu.memory_space<any>>) dst(%arg1 : memref<2x8x128xf32, #tpu.memory_space<any>>)
    return
  }
}

</mosaic_0001>

<bundles_post_ra>
// kernel: tpu_custom_call.1
= control target key start
LH: loop header
LB: loop body
LE: loop exit
PB: predicated region body
PF: predicated region fallthrough
CT: control target
= control target key end

     0   :  { %s29_s6 = smov [#allocation2]   ;;  %s30_s7 = smov 131072   ;;  %s48_s0 = inlined_call_operand.hbm [shape: f32[2,8,128], index: 0, kind: input, shape index: {}]   ;;  %s49_s1 = inlined_call_operand.hbm [shape: f32[2,8,128], index: 1, kind: output, shape index: {}]  }
   0x1   :  { %s31_s8 = smov 0  }
   0x2   :  { %12 = dma.general %s48_s0, 256, %s49_s1, %s29_s6, %s30_s7, [#allocation4], %s31_s8, 0  }
   0x3   :  { %27 = dma.done.wait [#allocation2], 256 }
   0x4   :  { %28 = vsyncadd [#allocation2], 4294967040 }
   0x5   :  { %17 = vsyncmov [#allocation2] }
   0x8   :  { %s18_s13 = vpop.sfrf %17 }
   0x9   :  { %p23_p0 = scmp.ne.s32.totalorder %s18_s13, 0 }
   0xb   :  { %22 = shalt.err (%p23_p0)  }

</bundles_post_ra>
